<compile_context>
chip_gen: v6e
topology: v6e:2x2x1
jax: 0.10.0
libtpu: 0.0.40
codegen_flags: <defaults>
</compile_context>

<pallas_src>
import functools

import jax
import jax.numpy as jnp
from jax.experimental import pallas as pl
from jax.experimental.pallas import tpu as pltpu

BN_EPS = 1e-5


# ---------------------------------------------------------------------------
# In-kernel math (operates on flattened channels-last (N*L, C) f32 arrays)
# ---------------------------------------------------------------------------
def _bn_swish(x2, gamma, beta):
    """BatchNorm1d with batch statistics folded to one per-channel FMA, then Swish.

    x2: (N*L, C) f32, gamma/beta: (1, C) f32.
    """
    mean = jnp.mean(x2, axis=0, keepdims=True)
    var = jnp.maximum(jnp.mean(x2 * x2, axis=0, keepdims=True) - mean * mean, 0.0)
    scale = gamma * jax.lax.rsqrt(var + BN_EPS)      # (1, C)
    shift = beta - mean * scale                      # (1, C)
    h = x2 * scale + shift                           # single FMA per element
    return h * jax.nn.sigmoid(h)                     # Swish (EUP sigmoid)


def _conv3(h, w_ref, b, valid_m1, valid_p1):
    """Conv1d(k=3, stride=1, pad=1) as three accumulating bf16 MXU matmuls.

    h: (N*L, Cin) f32 (channels-last, batch collapsed)
    w_ref: (3, Cin, Cout) bf16 ref (pre-flattened / pre-cast in the wrapper)
    b: (1, Cout) f32; valid_m1/valid_p1: (N*L, Cin) bool edge masks.
    """
    m = h.shape[0]
    # Shifted taps via XLU roll + edge masks; batch-boundary wraparound is masked away.
    h_m1 = jnp.where(valid_m1, pltpu.roll(h, 1, axis=0), 0.0)          # h[l-1]
    h_p1 = jnp.where(valid_p1, pltpu.roll(h, m - 1, axis=0), 0.0)      # h[l+1]
    # Three small K=Cin pushes (Cin << 128) — avoids the 3*Cin lane-axis concat;
    # bf16 appears only as the MXU operand cast, accumulation stays f32.
    y = jnp.dot(h_m1.astype(jnp.bfloat16), w_ref[0], preferred_element_type=jnp.float32)
    y = y + jnp.dot(h.astype(jnp.bfloat16), w_ref[1], preferred_element_type=jnp.float32)
    y = y + jnp.dot(h_p1.astype(jnp.bfloat16), w_ref[2], preferred_element_type=jnp.float32)
    return y + b


def cell_kernel(
    x_ref,
    g0_ref, be0_ref, w0_ref, b0_ref,
    g1_ref, be1_ref, w1_ref, b1_ref,
    wse1_ref, bse1_ref, wse2_ref, bse2_ref,
    o_ref,
    *, n_batch, seq_len,
):
    xs = x_ref[...]                                  # (N*L, C) f32
    m, c = xs.shape
    c_out = w0_ref.shape[-1]

    # Within-sequence position -> edge masks for the k=3 taps (built once, reused).
    pos = jax.lax.broadcasted_iota(jnp.int32, (n_batch, seq_len, c), 1).reshape(m, c)
    valid_m1 = pos > 0
    valid_p1 = pos < seq_len - 1

    # --- two 'res_bnswish' nodes: BN(batch stats) -> Swish -> Conv1d(k=3) ---
    s = _conv3(_bn_swish(xs, g0_ref[...], be0_ref[...]), w0_ref, b0_ref[...],
               valid_m1, valid_p1)
    s = _conv3(_bn_swish(s, g1_ref[...], be1_ref[...]), w1_ref, b1_ref[...],
               valid_m1, valid_p1)

    # --- Squeeze-Excite: global avg pool over L -> Linear/ReLU -> Linear/Sigmoid ---
    se = jnp.mean(s.reshape(n_batch, seq_len, c_out), axis=1)          # (N, Cout)
    h_se = jnp.maximum(
        jnp.dot(se, wse1_ref[...], preferred_element_type=jnp.float32) + bse1_ref[...],
        0.0,
    )                                                                  # (N, H)
    gate = jax.nn.sigmoid(
        jnp.dot(h_se, wse2_ref[...], preferred_element_type=jnp.float32) + bse2_ref[...]
    )                                                                  # (N, Cout)

    # --- residual combine (identity skip, Cin == Cout), one lane-dense slab store ---
    out = xs.reshape(n_batch, seq_len, c) + 0.1 * (
        s.reshape(n_batch, seq_len, c_out) * gate[:, None, :]
    )
    o_ref[...] = out.astype(o_ref.dtype)


# ---------------------------------------------------------------------------
# Wrapper: one pallas_call; layout plumbing (NCW<->NLC) stays in XLA.
# ---------------------------------------------------------------------------
@jax.jit
def cell_forward(x_ncl, params):
    N, Cin, L = x_ncl.shape
    Cout = params["w0"].shape[-1]
    assert Cin == Cout, "identity skip of the 'normal' cell requires Cin == Cout"

    # NCW -> flattened channels-last (N*L, C); wrapper-side relayout is ~free in XLA.
    x_flat = jnp.transpose(x_ncl, (0, 2, 1)).reshape(N * L, Cin)
    # Pre-cast conv weights to bf16 MXU layout before the kernel (halves weight DMA).
    w0 = params["w0"].astype(jnp.bfloat16)
    w1 = params["w1"].astype(jnp.bfloat16)

    args = (
        x_flat,
        params["g0"], params["be0"], w0, params["b0"],
        params["g1"], params["be1"], w1, params["b1"],
        params["wse1"], params["bse1"], params["wse2"], params["bse2"],
    )
    vmem = pl.BlockSpec(memory_space=pltpu.MemorySpace.VMEM)
    out_nlc = pl.pallas_call(
        functools.partial(cell_kernel, n_batch=N, seq_len=L),
        out_shape=jax.ShapeDtypeStruct((N, L, Cout), jnp.float32),
        in_specs=[vmem] * len(args),
        out_specs=vmem,
        compiler_params=pltpu.CompilerParams(vmem_limit_bytes=32 * 1024 * 1024),
    )(*args)
    return jnp.transpose(out_nlc, (0, 2, 1))         # NLC -> NCW (XLA, fused/free)


# ---------------------------------------------------------------------------
# Pure-JAX f32 reference (pad/slice conv formulation) for a correctness check.
# ---------------------------------------------------------------------------
def cell_reference(x_ncl, params):
    x = jnp.transpose(x_ncl, (0, 2, 1))  # NCW -> NLC

    def bn_swish_conv(h, g, be, w, b):
        mean = jnp.mean(h, axis=(0, 1), keepdims=True)
        var = jnp.var(h, axis=(0, 1), keepdims=True)
        hn = g[None] * (h - mean) * jax.lax.rsqrt(var + BN_EPS) + be[None]
        hn = hn * jax.nn.sigmoid(hn)
        N, L, C = h.shape
        zp = jnp.zeros((N, 1, C), h.dtype)
        hp = jnp.concatenate([zp, hn, zp], axis=1)
        y = jnp.zeros((N, L, w.shape[-1]), jnp.float32)
        for k in range(3):
            y = y + jnp.einsum("nlc,cd->nld", hp[:, k:k + L, :], w[k])
        return y + b[None]

    skip = x
    s = bn_swish_conv(x, params["g0"], params["be0"], params["w0"], params["b0"])
    s = bn_swish_conv(s, params["g1"], params["be1"], params["w1"], params["b1"])
    se = jnp.mean(s, axis=1)
    hh = jnp.maximum(se @ params["wse1"] + params["bse1"], 0.0)
    gate = jax.nn.sigmoid(hh @ params["wse2"] + params["bse2"])
    out = skip + 0.1 * s * gate[:, None, :]
    return jnp.transpose(out, (0, 2, 1))  # NLC -> NCW


def init_params(key, Cin, Cout):
    ks = jax.random.split(key, 8)
    H = max(Cout // 16, 4)  # SE hidden size
    scale = 0.1

    def conv_w(k, cin, cout):
        # torch layout (Cout, Cin, K) -> kernel layout (K, Cin, Cout)
        w = scale * jax.random.normal(k, (cout, cin, 3), jnp.float32)
        return jnp.transpose(w, (2, 1, 0))

    return {
        "g0": jnp.ones((1, Cin), jnp.float32),
        "be0": jnp.zeros((1, Cin), jnp.float32),
        "w0": conv_w(ks[0], Cin, Cout),
        "b0": scale * jax.random.normal(ks[1], (1, Cout), jnp.float32),
        "g1": jnp.ones((1, Cout), jnp.float32),
        "be1": jnp.zeros((1, Cout), jnp.float32),
        "w1": conv_w(ks[2], Cout, Cout),
        "b1": scale * jax.random.normal(ks[3], (1, Cout), jnp.float32),
        "wse1": scale * jax.random.normal(ks[4], (Cout, H), jnp.float32),
        "bse1": scale * jax.random.normal(ks[5], (1, H), jnp.float32),
        "wse2": scale * jax.random.normal(ks[6], (H, Cout), jnp.float32),
        "bse2": scale * jax.random.normal(ks[7], (1, Cout), jnp.float32),
    }


if __name__ == "__main__":
    key = jax.random.PRNGKey(0)
    kx, kp = jax.random.split(key)

    N, C, L = 2, 32, 16           # batch, channels (Cin == Cout), sequence length
    x = jax.random.normal(kx, (N, C, L), jnp.float32)   # PyTorch NCW layout
    params = init_params(kp, C, C)

    out = jax.block_until_ready(cell_forward(x, params))
    ref = cell_reference(x, params)

    assert out.shape == (N, C, L)
    # bf16 MXU operands with f32 accumulation -> loose-ish but meaningful tolerance.
    assert jnp.allclose(out, ref, atol=3e-2, rtol=3e-2), "Pallas kernel mismatch vs JAX reference"

    print("KERNEL_OK")
</pallas_src>

<mosaic_0001>
module attributes {stable_mosaic.version = 11 : i64} {
  func.func @cell_kernel(%arg0: memref<32x32xf32, #tpu.memory_space<vmem>>, %arg1: memref<1x32xf32, #tpu.memory_space<vmem>>, %arg2: memref<1x32xf32, #tpu.memory_space<vmem>>, %arg3: memref<3x32x32xbf16, #tpu.memory_space<vmem>>, %arg4: memref<1x32xf32, #tpu.memory_space<vmem>>, %arg5: memref<1x32xf32, #tpu.memory_space<vmem>>, %arg6: memref<1x32xf32, #tpu.memory_space<vmem>>, %arg7: memref<3x32x32xbf16, #tpu.memory_space<vmem>>, %arg8: memref<1x32xf32, #tpu.memory_space<vmem>>, %arg9: memref<32x4xf32, #tpu.memory_space<vmem>>, %arg10: memref<1x4xf32, #tpu.memory_space<vmem>>, %arg11: memref<4x32xf32, #tpu.memory_space<vmem>>, %arg12: memref<1x32xf32, #tpu.memory_space<vmem>>, %arg13: memref<2x16x32xf32, #tpu.memory_space<vmem>>) attributes {dimension_semantics = [], scalar_prefetch = 0 : i64, scratch_operands = 0 : i64, tpu.core_type = #tpu.core_type<tc>} {
    %c0 = arith.constant 0 : index
    %c0_0 = arith.constant 0 : index
    %0 = vector.load %arg0[%c0, %c0_0] : memref<32x32xf32, #tpu.memory_space<vmem>>, vector<32x32xf32>
    %1 = tpu.iota {dimensions = array<i32: 1>} : vector<2x16x32xi32>
    %2 = vector.shape_cast %1 : vector<2x16x32xi32> to vector<32x32xi32>
    %c0_i32 = arith.constant 0 : i32
    %3 = vector.broadcast %c0_i32 : i32 to vector<32x32xi32>
    %4 = arith.cmpi sgt, %2, %3 : vector<32x32xi32>
    %c15_i32 = arith.constant 15 : i32
    %5 = vector.broadcast %c15_i32 : i32 to vector<32x32xi32>
    %6 = arith.cmpi slt, %2, %5 : vector<32x32xi32>
    %c0_1 = arith.constant 0 : index
    %c0_2 = arith.constant 0 : index
    %7 = vector.load %arg1[%c0_1, %c0_2] : memref<1x32xf32, #tpu.memory_space<vmem>>, vector<1x32xf32>
    %c0_3 = arith.constant 0 : index
    %c0_4 = arith.constant 0 : index
    %8 = vector.load %arg2[%c0_3, %c0_4] : memref<1x32xf32, #tpu.memory_space<vmem>>, vector<1x32xf32>
    %cst = arith.constant dense<0.000000e+00> : vector<32xf32>
    %9 = vector.multi_reduction <add>, %0, %cst [0] : vector<32x32xf32> to vector<32xf32>
    %10 = vector.shape_cast %9 : vector<32xf32> to vector<1x32xf32>
    %cst_5 = arith.constant 3.200000e+01 : f32
    %11 = vector.broadcast %cst_5 : f32 to vector<1x32xf32>
    %12 = arith.divf %10, %11 : vector<1x32xf32>
    %13 = arith.mulf %0, %0 : vector<32x32xf32>
    %cst_6 = arith.constant dense<0.000000e+00> : vector<32xf32>
    %14 = vector.multi_reduction <add>, %13, %cst_6 [0] : vector<32x32xf32> to vector<32xf32>
    %15 = vector.shape_cast %14 : vector<32xf32> to vector<1x32xf32>
    %cst_7 = arith.constant 3.200000e+01 : f32
    %16 = vector.broadcast %cst_7 : f32 to vector<1x32xf32>
    %17 = arith.divf %15, %16 : vector<1x32xf32>
    %18 = arith.mulf %12, %12 : vector<1x32xf32>
    %19 = arith.subf %17, %18 : vector<1x32xf32>
    %cst_8 = arith.constant 0.000000e+00 : f32
    %20 = vector.broadcast %cst_8 : f32 to vector<1x32xf32>
    %21 = arith.maximumf %19, %20 : vector<1x32xf32>
    %cst_9 = arith.constant 9.99999974E-6 : f32
    %22 = vector.broadcast %cst_9 : f32 to vector<1x32xf32>
    %23 = arith.addf %21, %22 : vector<1x32xf32>
    %24 = math.rsqrt %23 : vector<1x32xf32>
    %25 = arith.mulf %7, %24 : vector<1x32xf32>
    %26 = arith.mulf %12, %25 : vector<1x32xf32>
    %27 = arith.subf %8, %26 : vector<1x32xf32>
    %28 = vector.broadcast %25 : vector<1x32xf32> to vector<32x32xf32>
    %29 = arith.mulf %0, %28 : vector<32x32xf32>
    %30 = vector.broadcast %27 : vector<1x32xf32> to vector<32x32xf32>
    %31 = arith.addf %29, %30 : vector<32x32xf32>
    %32 = arith.negf %31 : vector<32x32xf32>
    %33 = math.exp %32 : vector<32x32xf32>
    %cst_10 = arith.constant 1.000000e+00 : f32
    %34 = vector.broadcast %cst_10 : f32 to vector<32x32xf32>
    %35 = arith.addf %34, %33 : vector<32x32xf32>
    %36 = arith.divf %34, %35 : vector<32x32xf32>
    %37 = arith.mulf %31, %36 : vector<32x32xf32>
    %c0_11 = arith.constant 0 : index
    %c0_12 = arith.constant 0 : index
    %38 = vector.load %arg4[%c0_11, %c0_12] : memref<1x32xf32, #tpu.memory_space<vmem>>, vector<1x32xf32>
    %c1_i32 = arith.constant 1 : i32
    %39 = tpu.dynamic_rotate %37 by %c1_i32 dim 0 : vector<32x32xf32>, i32 -> vector<32x32xf32>
    %cst_13 = arith.constant 0.000000e+00 : f32
    %40 = vector.broadcast %cst_13 : f32 to vector<32x32xf32>
    %41 = arith.select %4, %39, %40 : vector<32x32xi1>, vector<32x32xf32>
    %c31_i32 = arith.constant 31 : i32
    %42 = tpu.dynamic_rotate %37 by %c31_i32 dim 0 : vector<32x32xf32>, i32 -> vector<32x32xf32>
    %cst_14 = arith.constant 0.000000e+00 : f32
    %43 = vector.broadcast %cst_14 : f32 to vector<32x32xf32>
    %44 = arith.select %6, %42, %43 : vector<32x32xi1>, vector<32x32xf32>
    %45 = arith.truncf %41 : vector<32x32xf32> to vector<32x32xbf16>
    %c0_15 = arith.constant 0 : index
    %c0_16 = arith.constant 0 : index
    %c0_17 = arith.constant 0 : index
    %46 = vector.load %arg3[%c0_15, %c0_16, %c0_17] : memref<3x32x32xbf16, #tpu.memory_space<vmem>>, vector<1x32x32xbf16>
    %47 = vector.shape_cast %46 : vector<1x32x32xbf16> to vector<32x32xbf16>
    %cst_18 = arith.constant dense<0.000000e+00> : vector<32x32xf32>
    %48 = tpu.matmul %45, %47, %cst_18 {dimension_numbers = #tpu.dot_dimension_numbers<[1], [0], [0], [1], [0, 0, 1, 1], [], []>} : vector<32x32xbf16>, vector<32x32xbf16>, vector<32x32xf32> -> vector<32x32xf32>
    %49 = arith.truncf %37 : vector<32x32xf32> to vector<32x32xbf16>
    %c1 = arith.constant 1 : index
    %c0_19 = arith.constant 0 : index
    %c0_20 = arith.constant 0 : index
    %50 = vector.load %arg3[%c1, %c0_19, %c0_20] : memref<3x32x32xbf16, #tpu.memory_space<vmem>>, vector<1x32x32xbf16>
    %51 = vector.shape_cast %50 : vector<1x32x32xbf16> to vector<32x32xbf16>
    %cst_21 = arith.constant dense<0.000000e+00> : vector<32x32xf32>
    %52 = tpu.matmul %49, %51, %cst_21 {dimension_numbers = #tpu.dot_dimension_numbers<[1], [0], [0], [1], [0, 0, 1, 1], [], []>} : vector<32x32xbf16>, vector<32x32xbf16>, vector<32x32xf32> -> vector<32x32xf32>
    %53 = arith.addf %48, %52 : vector<32x32xf32>
    %54 = arith.truncf %44 : vector<32x32xf32> to vector<32x32xbf16>
    %c2 = arith.constant 2 : index
    %c0_22 = arith.constant 0 : index
    %c0_23 = arith.constant 0 : index
    %55 = vector.load %arg3[%c2, %c0_22, %c0_23] : memref<3x32x32xbf16, #tpu.memory_space<vmem>>, vector<1x32x32xbf16>
    %56 = vector.shape_cast %55 : vector<1x32x32xbf16> to vector<32x32xbf16>
    %cst_24 = arith.constant dense<0.000000e+00> : vector<32x32xf32>
    %57 = tpu.matmul %54, %56, %cst_24 {dimension_numbers = #tpu.dot_dimension_numbers<[1], [0], [0], [1], [0, 0, 1, 1], [], []>} : vector<32x32xbf16>, vector<32x32xbf16>, vector<32x32xf32> -> vector<32x32xf32>
    %58 = arith.addf %53, %57 : vector<32x32xf32>
    %59 = vector.broadcast %38 : vector<1x32xf32> to vector<32x32xf32>
    %60 = arith.addf %58, %59 : vector<32x32xf32>
    %c0_25 = arith.constant 0 : index
    %c0_26 = arith.constant 0 : index
    %61 = vector.load %arg5[%c0_25, %c0_26] : memref<1x32xf32, #tpu.memory_space<vmem>>, vector<1x32xf32>
    %c0_27 = arith.constant 0 : index
    %c0_28 = arith.constant 0 : index
    %62 = vector.load %arg6[%c0_27, %c0_28] : memref<1x32xf32, #tpu.memory_space<vmem>>, vector<1x32xf32>
    %cst_29 = arith.constant dense<0.000000e+00> : vector<32xf32>
    %63 = vector.multi_reduction <add>, %60, %cst_29 [0] : vector<32x32xf32> to vector<32xf32>
    %64 = vector.shape_cast %63 : vector<32xf32> to vector<1x32xf32>
    %cst_30 = arith.constant 3.200000e+01 : f32
    %65 = vector.broadcast %cst_30 : f32 to vector<1x32xf32>
    %66 = arith.divf %64, %65 : vector<1x32xf32>
    %67 = arith.mulf %60, %60 : vector<32x32xf32>
    %cst_31 = arith.constant dense<0.000000e+00> : vector<32xf32>
    %68 = vector.multi_reduction <add>, %67, %cst_31 [0] : vector<32x32xf32> to vector<32xf32>
    %69 = vector.shape_cast %68 : vector<32xf32> to vector<1x32xf32>
    %cst_32 = arith.constant 3.200000e+01 : f32
    %70 = vector.broadcast %cst_32 : f32 to vector<1x32xf32>
    %71 = arith.divf %69, %70 : vector<1x32xf32>
    %72 = arith.mulf %66, %66 : vector<1x32xf32>
    %73 = arith.subf %71, %72 : vector<1x32xf32>
    %cst_33 = arith.constant 0.000000e+00 : f32
    %74 = vector.broadcast %cst_33 : f32 to vector<1x32xf32>
    %75 = arith.maximumf %73, %74 : vector<1x32xf32>
    %cst_34 = arith.constant 9.99999974E-6 : f32
    %76 = vector.broadcast %cst_34 : f32 to vector<1x32xf32>
    %77 = arith.addf %75, %76 : vector<1x32xf32>
    %78 = math.rsqrt %77 : vector<1x32xf32>
    %79 = arith.mulf %61, %78 : vector<1x32xf32>
    %80 = arith.mulf %66, %79 : vector<1x32xf32>
    %81 = arith.subf %62, %80 : vector<1x32xf32>
    %82 = vector.broadcast %79 : vector<1x32xf32> to vector<32x32xf32>
    %83 = arith.mulf %60, %82 : vector<32x32xf32>
    %84 = vector.broadcast %81 : vector<1x32xf32> to vector<32x32xf32>
    %85 = arith.addf %83, %84 : vector<32x32xf32>
    %86 = arith.negf %85 : vector<32x32xf32>
    %87 = math.exp %86 : vector<32x32xf32>
    %cst_35 = arith.constant 1.000000e+00 : f32
    %88 = vector.broadcast %cst_35 : f32 to vector<32x32xf32>
    %89 = arith.addf %88, %87 : vector<32x32xf32>
    %90 = arith.divf %88, %89 : vector<32x32xf32>
    %91 = arith.mulf %85, %90 : vector<32x32xf32>
    %c0_36 = arith.constant 0 : index
    %c0_37 = arith.constant 0 : index
    %92 = vector.load %arg8[%c0_36, %c0_37] : memref<1x32xf32, #tpu.memory_space<vmem>>, vector<1x32xf32>
    %c1_i32_38 = arith.constant 1 : i32
    %93 = tpu.dynamic_rotate %91 by %c1_i32_38 dim 0 : vector<32x32xf32>, i32 -> vector<32x32xf32>
    %cst_39 = arith.constant 0.000000e+00 : f32
    %94 = vector.broadcast %cst_39 : f32 to vector<32x32xf32>
    %95 = arith.select %4, %93, %94 : vector<32x32xi1>, vector<32x32xf32>
    %c31_i32_40 = arith.constant 31 : i32
    %96 = tpu.dynamic_rotate %91 by %c31_i32_40 dim 0 : vector<32x32xf32>, i32 -> vector<32x32xf32>
    %cst_41 = arith.constant 0.000000e+00 : f32
    %97 = vector.broadcast %cst_41 : f32 to vector<32x32xf32>
    %98 = arith.select %6, %96, %97 : vector<32x32xi1>, vector<32x32xf32>
    %99 = arith.truncf %95 : vector<32x32xf32> to vector<32x32xbf16>
    %c0_42 = arith.constant 0 : index
    %c0_43 = arith.constant 0 : index
    %c0_44 = arith.constant 0 : index
    %100 = vector.load %arg7[%c0_42, %c0_43, %c0_44] : memref<3x32x32xbf16, #tpu.memory_space<vmem>>, vector<1x32x32xbf16>
    %101 = vector.shape_cast %100 : vector<1x32x32xbf16> to vector<32x32xbf16>
    %cst_45 = arith.constant dense<0.000000e+00> : vector<32x32xf32>
    %102 = tpu.matmul %99, %101, %cst_45 {dimension_numbers = #tpu.dot_dimension_numbers<[1], [0], [0], [1], [0, 0, 1, 1], [], []>} : vector<32x32xbf16>, vector<32x32xbf16>, vector<32x32xf32> -> vector<32x32xf32>
    %103 = arith.truncf %91 : vector<32x32xf32> to vector<32x32xbf16>
    %c1_46 = arith.constant 1 : index
    %c0_47 = arith.constant 0 : index
    %c0_48 = arith.constant 0 : index
    %104 = vector.load %arg7[%c1_46, %c0_47, %c0_48] : memref<3x32x32xbf16, #tpu.memory_space<vmem>>, vector<1x32x32xbf16>
    %105 = vector.shape_cast %104 : vector<1x32x32xbf16> to vector<32x32xbf16>
    %cst_49 = arith.constant dense<0.000000e+00> : vector<32x32xf32>
    %106 = tpu.matmul %103, %105, %cst_49 {dimension_numbers = #tpu.dot_dimension_numbers<[1], [0], [0], [1], [0, 0, 1, 1], [], []>} : vector<32x32xbf16>, vector<32x32xbf16>, vector<32x32xf32> -> vector<32x32xf32>
    %107 = arith.addf %102, %106 : vector<32x32xf32>
    %108 = arith.truncf %98 : vector<32x32xf32> to vector<32x32xbf16>
    %c2_50 = arith.constant 2 : index
    %c0_51 = arith.constant 0 : index
    %c0_52 = arith.constant 0 : index
    %109 = vector.load %arg7[%c2_50, %c0_51, %c0_52] : memref<3x32x32xbf16, #tpu.memory_space<vmem>>, vector<1x32x32xbf16>
    %110 = vector.shape_cast %109 : vector<1x32x32xbf16> to vector<32x32xbf16>
    %cst_53 = arith.constant dense<0.000000e+00> : vector<32x32xf32>
    %111 = tpu.matmul %108, %110, %cst_53 {dimension_numbers = #tpu.dot_dimension_numbers<[1], [0], [0], [1], [0, 0, 1, 1], [], []>} : vector<32x32xbf16>, vector<32x32xbf16>, vector<32x32xf32> -> vector<32x32xf32>
    %112 = arith.addf %107, %111 : vector<32x32xf32>
    %113 = vector.broadcast %92 : vector<1x32xf32> to vector<32x32xf32>
    %114 = arith.addf %112, %113 : vector<32x32xf32>
    %115 = vector.shape_cast %114 : vector<32x32xf32> to vector<2x16x32xf32>
    %cst_54 = arith.constant dense<0.000000e+00> : vector<2x32xf32>
    %116 = vector.multi_reduction <add>, %115, %cst_54 [1] : vector<2x16x32xf32> to vector<2x32xf32>
    %cst_55 = arith.constant 1.600000e+01 : f32
    %117 = vector.broadcast %cst_55 : f32 to vector<2x32xf32>
    %118 = arith.divf %116, %117 : vector<2x32xf32>
    %c0_56 = arith.constant 0 : index
    %c0_57 = arith.constant 0 : index
    %119 = vector.load %arg9[%c0_56, %c0_57] : memref<32x4xf32, #tpu.memory_space<vmem>>, vector<32x4xf32>
    %cst_58 = arith.constant dense<0.000000e+00> : vector<2x4xf32>
    %120 = tpu.matmul %118, %119, %cst_58 {dimension_numbers = #tpu.dot_dimension_numbers<[1], [0], [0], [1], [0, 0, 1, 1], [], []>} : vector<2x32xf32>, vector<32x4xf32>, vector<2x4xf32> -> vector<2x4xf32>
    %c0_59 = arith.constant 0 : index
    %c0_60 = arith.constant 0 : index
    %121 = vector.load %arg10[%c0_59, %c0_60] : memref<1x4xf32, #tpu.memory_space<vmem>>, vector<1x4xf32>
    %122 = vector.broadcast %121 : vector<1x4xf32> to vector<2x4xf32>
    %123 = arith.addf %120, %122 : vector<2x4xf32>
    %cst_61 = arith.constant 0.000000e+00 : f32
    %124 = vector.broadcast %cst_61 : f32 to vector<2x4xf32>
    %125 = arith.maximumf %123, %124 : vector<2x4xf32>
    %c0_62 = arith.constant 0 : index
    %c0_63 = arith.constant 0 : index
    %126 = vector.load %arg11[%c0_62, %c0_63] : memref<4x32xf32, #tpu.memory_space<vmem>>, vector<4x32xf32>
    %cst_64 = arith.constant dense<0.000000e+00> : vector<2x32xf32>
    %127 = tpu.matmul %125, %126, %cst_64 {dimension_numbers = #tpu.dot_dimension_numbers<[1], [0], [0], [1], [0, 0, 1, 1], [], []>} : vector<2x4xf32>, vector<4x32xf32>, vector<2x32xf32> -> vector<2x32xf32>
    %c0_65 = arith.constant 0 : index
    %c0_66 = arith.constant 0 : index
    %128 = vector.load %arg12[%c0_65, %c0_66] : memref<1x32xf32, #tpu.memory_space<vmem>>, vector<1x32xf32>
    %129 = vector.broadcast %128 : vector<1x32xf32> to vector<2x32xf32>
    %130 = arith.addf %127, %129 : vector<2x32xf32>
    %131 = arith.negf %130 : vector<2x32xf32>
    %132 = math.exp %131 : vector<2x32xf32>
    %cst_67 = arith.constant 1.000000e+00 : f32
    %133 = vector.broadcast %cst_67 : f32 to vector<2x32xf32>
    %134 = arith.addf %133, %132 : vector<2x32xf32>
    %135 = arith.divf %133, %134 : vector<2x32xf32>
    %136 = vector.shape_cast %0 : vector<32x32xf32> to vector<2x16x32xf32>
    %137 = vector.shape_cast %114 : vector<32x32xf32> to vector<2x16x32xf32>
    %138 = vector.shape_cast %135 : vector<2x32xf32> to vector<2x1x32xf32>
    %139 = vector.broadcast %138 : vector<2x1x32xf32> to vector<2x16x32xf32>
    %140 = arith.mulf %137, %139 : vector<2x16x32xf32>
    %cst_68 = arith.constant 1.000000e-01 : f32
    %141 = vector.broadcast %cst_68 : f32 to vector<2x16x32xf32>
    %142 = arith.mulf %141, %140 : vector<2x16x32xf32>
    %143 = arith.addf %136, %142 : vector<2x16x32xf32>
    %c0_69 = arith.constant 0 : index
    %c0_70 = arith.constant 0 : index
    %c0_71 = arith.constant 0 : index
    %144 = vector.load %arg13[%c0_69, %c0_70, %c0_71] : memref<2x16x32xf32, #tpu.memory_space<vmem>>, vector<2x16x32xf32>
    tpu.vector_store %arg13[%c0_69, %c0_70, %c0_71], %143 {strides = array<i32>} : memref<2x16x32xf32, #tpu.memory_space<vmem>>, vector<2x16x32xf32>,
    return
  }
}

</mosaic_0001>

<bundles_post_ra>
// kernel: cell_forward.1
= control target key start
LH: loop header
LB: loop body
LE: loop exit
PB: predicated region body
PF: predicated region fallthrough
CT: control target
= control target key end

     0   :  { %vm59_vm0 = vcmask 261120   ;;  %s1564_s0 = inlined_call_operand.vmem [shape: f32[32,32], index: 0, kind: input, shape index: {}]   ;;  %s1565_s1 = inlined_call_operand.vmem [shape: f32[1,32], index: 1, kind: input, shape index: {}]   ;;  %s1566_s2 = inlined_call_operand.vmem [shape: f32[1,32], index: 2, kind: input, shape index: {}]   ;;  %s1567_s3 = inlined_call_operand.vmem [shape: bf16[3,32,32], index: 3, kind: input, shape index: {}]   ;;  %s1568_s4 = inlined_call_operand.vmem [shape: f32[1,32], index: 4, kind: input, shape index: {}]   ;;  %s1569_s5 = inlined_call_operand.vmem [shape: f32[1,32], index: 5, kind: input, shape index: {}]   ;;  %s1570_s6 = inlined_call_operand.vmem [shape: f32[1,32], index: 6, kind: input, shape index: {}]   ;;  %s1571_s7 = inlined_call_operand.vmem [shape: bf16[3,32,32], index: 7, kind: input, shape index: {}]   ;;  %s1572_s8 = inlined_call_operand.vmem [shape: f32[1,32], index: 8, kind: input, shape index: {}]   ;;  %s1573_s9 = inlined_call_operand.vmem [shape: f32[32,4], index: 9, kind: input, shape index: {}]   ;;  %s1574_s10 = inlined_call_operand.vmem [shape: f32[1,4], index: 10, kind: input, shape index: {}]   ;;  %s1575_s11 = inlined_call_operand.vmem [shape: f32[4,32], index: 11, kind: input, shape index: {}]   ;;  %s1576_s12 = inlined_call_operand.vmem [shape: f32[1,32], index: 12, kind: input, shape index: {}]   ;;  %s1577_s13 = inlined_call_operand.hbm [shape: f32[2,16,32], index: 13, kind: output, shape index: {}]  }
   0x1   :  { %v1184_v0 = vld [vmem:[%s1567_s3 + $0x18] sm:$0xff]   ;;  %v1185_v1 = vld [vmem:[%s1567_s3 + $0x10] sm:$0xff]   ;;  %v1186_v2 = vld [vmem:[%s1567_s3 + $0x8] sm:$0xff]  }
   0x2   :  { %1114 = vmatprep.subr.bf16.mxu0 %v1184_v0  ;;  %v1346_v3 = vld [vmem:[%s1564_s0] sm:$0xff]  ;;  %v1351_v4 = vld [vmem:[%s1564_s0 + $0x8] sm:$0xff]  ;;  %v1356_v5 = vld [vmem:[%s1564_s0 + $0x10] sm:$0xff]  ;;  %1122 = vmatprep.subr.bf16.mxu1 %v1186_v2 }
   0x3   :  { %1115 = vmatpush3.bf16.msra.mxu0 %v1184_v0  ;;  %v1361_v6 = vld [vmem:[%s1564_s0 + $0x18] sm:$0xff]  ;;  %v60_v7 = vsel %vm59_vm0, %v1346_v3, 0.0  ;;  %v75_v8 = vmul.f32 %v1346_v3, %v1346_v3  ;;  %v76_v9 = vmul.f32 %v1351_v4, %v1351_v4  ;;  %v77_v10 = vmul.f32 %v1356_v5, %v1356_v5  ;;  %1123 = vmatpush3.bf16.msra.mxu1 %v1186_v2  ;;  %v1380_v14 = vld [vmem:[%s1567_s3 + $0x28] sm:$0xff]   ;;  %v1188_v19 = vld [vmem:[%s1567_s3] sm:$0xff]  }
   0x4   :  { %1116 = vmatprep.subr.bf16.mxu0 %v1185_v1  ;;  %v61_v11 = vsel %vm59_vm0, %v1351_v4, 0.0  ;;  %v63_v12 = vsel %vm59_vm0, %v1356_v5, 0.0  ;;  %v78_v13 = vmul.f32 %v1361_v6, %v1361_v6  ;;  %v65_v20 = vsel %vm59_vm0, %v1361_v6, 0.0  ;;  %1124 = vmatprep.subr.bf16.mxu1 %v1188_v19 }
   0x5   :  { %v62_v15 = vadd.f32 %v61_v11, %v60_v7  ;;  %v79_v16 = vsel %vm59_vm0, %v75_v8, 0.0  ;;  %v80_v17 = vsel %vm59_vm0, %v76_v9, 0.0  ;;  %v82_v18 = vsel %vm59_vm0, %v77_v10, 0.0 }
   0x6   :  { %v81_v21 = vadd.f32 %v80_v17, %v79_v16  ;;  %v84_v23 = vsel %vm59_vm0, %v78_v13, 0.0 }
   0x7   :  { %1117 = vmatpush3.bf16.msra.mxu0 %v1185_v1  ;;  %v64_v22 = vadd.f32 %v63_v12, %v62_v15  ;;  %1125 = vmatpush3.bf16.msra.mxu1 %v1188_v19 }
   0x8   :  { %1130 = vmatprep.subr.bf16.mxu0 %v1380_v14  ;;  %v83_v24 = vadd.f32 %v82_v18, %v81_v21 }
   0x9   :  { %v66_v25 = vadd.f32 %v65_v20, %v64_v22 }
   0xa   :  { %v85_v26 = vadd.f32 %v84_v23, %v83_v24 }
   0xb   :  { %v67_v27 = vrot.slane %v66_v25, 4 }
   0xc   :  { %v86_v28 = vrot.slane %v85_v26, 4 }
   0xd   :  { %v68_v29 = vadd.f32 %v67_v27, %v66_v25 }
   0xe   :  { %18 = vsyncpa [#allocation3], 0  ;;  %v87_v30 = vadd.f32 %v86_v28, %v85_v26  ;;  %v50_v45 = vlaneseq  ;;  %v57_v47 = vld [vmem:[%s1565_s1] sm:$0x1]  ;;  %vm1259_vm5 = vmmov 0   ;;  %vm882_vm6 = vcmask 1043456  }
   0xf   :  { %v69_v31 = vrot.slane %v68_v29, 2  ;;  %v58_v51 = vld [vmem:[%s1566_s2] sm:$0x1]  ;;  %vm795_vm7 = vcmask 1041409   ;;  %vm878_vm8 = vcmask 31744  }
  0x10   :  { %v88_v32 = vrot.slane %v87_v30, 2  ;;  %v1392_v46 = vshrl.u32 %v50_v45, 7 }
  0x11   :  { %v70_v33 = vadd.f32 %v69_v31, %v68_v29 }
  0x12   :  { %v89_v34 = vadd.f32 %v88_v32, %v87_v30  ;;  %v1398_v48 = vsub.s32 0, %v1392_v46  ;;  %v1410_v20 = vadd.s32 8, %v1392_v46  ;;  %vm154_vm1 = vcmp.lt.s32.totalorder %v1392_v46, 1 }
  0x13   :  { %v71_v35 = vrot.slane %v70_v33, 1  ;;  %vm167_vm2 = vcmp.lt.s32.totalorder %v1392_v46, 7  ;;  %vm53_vm3 = vcmp.gt.s32.totalorder %v1392_v46, 0 }
  0x14   :  { %v90_v36 = vrot.slane %v89_v34, 1  ;;  %vm56_vm4 = vcmp.lt.s32.totalorder %v1410_v20, 15  ;;  %v783_v20 = vld [vmem:[%s1573_s9 + $0x8] sm:$0xff] }
  0x15   :  { %v72_v37 = vadd.f32 %v71_v35, %v70_v33 }
  0x16   :  { %v91_v38 = vadd.f32 %v90_v36, %v89_v34  ;;  %v1189_v36 = vld [vmem:[%s1567_s3 + $0x20] sm:$0xff]  }
  0x17   :  { %v74_v39 = vmul.f32 0.03125, %v72_v37 }
  0x18   :  { %v92_v40 = vmul.f32 0.03125, %v91_v38 }
  0x19   :  { %v93_v41 = vmul.f32 %v74_v39, %v74_v39 }
  0x1b   :  { %v94_v42 = vsub.f32 %v92_v40, %v93_v41 }
  0x1d   :  { %v95_v43 = vmax.f32 %v94_v42, 0.0 }
  0x1f   :  { %v96_v44 = vadd.f32 1e-05, %v95_v43 }
  0x21   :  { %1196 = vrsqrt.f32 %v96_v44 }
  0x2e   :  { %v1197_v49 = vpop.eup %1196 }
  0x2f   :  { %v98_v50 = vmul.f32 %v1197_v49, %v57_v47 }
  0x31   :  { %v99_v52 = vmul.f32 %v98_v50, %v74_v39  ;;  %v105_v53 = vrot.slane %v98_v50, %v1398_v48 }
  0x33   :  { %v100_v54 = vsub.f32 %v58_v51, %v99_v52  ;;  %v107_v55 = vmul.f32 %v105_v53, %v1346_v3  ;;  %v108_v56 = vmul.f32 %v105_v53, %v1351_v4  ;;  %v109_v57 = vmul.f32 %v105_v53, %v1356_v5 }
  0x34   :  { %v110_v58 = vmul.f32 %v105_v53, %v1361_v6 }
  0x35   :  { %v115_v59 = vrot.slane %v100_v54, %v1398_v48  ;;  %v1190_v54 = vld [vmem:[%s1571_s7 + $0x18] sm:$0xff]  }
  0x36   :  { %1138 = vmatprep.subr.bf16.mxu1 %v1190_v54 }
  0x37   :  { %v117_v60 = vadd.f32 %v115_v59, %v107_v55  ;;  %v118_v61 = vadd.f32 %v115_v59, %v108_v56  ;;  %v119_v62 = vadd.f32 %v115_v59, %v109_v57  ;;  %v120_v63 = vadd.f32 %v115_v59, %v110_v58  ;;  %v1191_v55 = vld [vmem:[%s1571_s7 + $0x10] sm:$0xff]   ;;  %v1192_v56 = vld [vmem:[%s1571_s7 + $0x8] sm:$0xff]   ;;  %v1194_v58 = vld [vmem:[%s1571_s7] sm:$0xff]  }
  0x38   :  { %v1462_v57 = vld [vmem:[%s1571_s7 + $0x28] sm:$0xff]  }
  0x39   :  { %v1027_v0 = vmul.f32 -1.442695, %v117_v60  ;;  %v1028_v1 = vmul.f32 -1.442695, %v118_v61  ;;  %v1029_v2 = vmul.f32 -1.442695, %v119_v62 }
  0x3a   :  { %v1030_v7 = vmul.f32 -1.442695, %v120_v63 }
  0x3b   :  { %1198 = vpow2.f32 %v1027_v0 }
  0x3c   :  { %1200 = vpow2.f32 %v1028_v1 }
  0x3d   :  { %1202 = vpow2.f32 %v1029_v2 }
  0x3e   :  { %1204 = vpow2.f32 %v1030_v7 }
  0x48   :  { %v1199_v8 = vpop.eup %1198 }
  0x49   :  { %v1201_v9 = vpop.eup %1200  ;;  %v133_v10 = vadd.f32 1.0, %v1199_v8 }
  0x4a   :  { %v1203_v11 = vpop.eup %1202  ;;  %v134_v12 = vadd.f32 1.0, %v1201_v9 }
  0x4b   :  { %v1205_v13 = vpop.eup %1204  ;;  %1206 = vrcp.f32 %v133_v10  ;;  %v135_v15 = vadd.f32 1.0, %v1203_v11 }
  0x4c   :  { %1208 = vrcp.f32 %v134_v12  ;;  %v136_v16 = vadd.f32 1.0, %v1205_v13 }
  0x4d   :  { %1210 = vrcp.f32 %v135_v15 }
  0x4e   :  { %1212 = vrcp.f32 %v136_v16  ;;  %v1051_v16 = vld [vmem:[%s1568_s4] ss:$0 sm:$0xff] }
  0x58   :  { %v1207_v17 = vpop.eup %1206 }
  0x59   :  { %v1209_v18 = vpop.eup %1208  ;;  %v145_v19 = vmul.f32 %v1207_v17, %v117_v60 }
  0x5a   :  { %v1211_v21 = vpop.eup %1210  ;;  %v146_v22 = vmul.f32 %v1209_v18, %v118_v61 }
  0x5b   :  { %v1213_v23 = vpop.eup %1212  ;;  %v163_v24 = vrot.slane %v145_v19, 1  ;;  %v147_v25 = vmul.f32 %v1211_v21, %v119_v62  ;;  %v150_v26 = vrot.slane %v145_v19, 7 }
  0x5c   :  { %v164_v27 = vrot.slane %v146_v22, 1  ;;  %v182_v28 = vpack.c.bf16 %v146_v22, %v145_v19  ;;  %v148_v29 = vmul.f32 %v1213_v23, %v120_v63  ;;  %v151_v30 = vrot.slane %v146_v22, 7 }
  0x5d   :  { %v152_v31 = vrot.slane %v147_v25, 7  ;;  %v165_v32 = vrot.slane %v147_v25, 1 }
  0x5e   :  { %1118 = vmatprep.mubr.msk.bf16.mxu0 %vm59_vm0, %v182_v28  ;;  %v166_v33 = vrot.slane %v148_v29, 1  ;;  %v183_v34 = vpack.c.bf16 %v148_v29, %v147_v25  ;;  %v153_v35 = vrot.slane %v148_v29, 7  ;;  %v157_v37 = vsel %vm154_vm1, %v150_v26, %v151_v30 }
  0x5f   :  { %v156_v38 = vsel %vm154_vm1, %v151_v30, %v152_v31  ;;  %v169_v39 = vsel %vm167_vm2, %v164_v27, %v165_v32  ;;  %v170_v40 = vsel %vm167_vm2, %v163_v24, %v164_v27 }
  0x60   :  { %1119 = vmatmul.mubr.msk.bf16.vlgmr.msra.gmra.mxu0 %vm59_vm0, %v183_v34  ;;  %v158_v41 = vsel %vm154_vm1, %v153_v35, %v150_v26  ;;  %v155_v42 = vsel %vm154_vm1, %v152_v31, %v153_v35  ;;  %v161_v43 = vsel %vm53_vm3, %v156_v38, 0.0  ;;  %v173_v44 = vsel %vm56_vm4, %v169_v39, 0.0 }
  0x61   :  { %1131 = vmatpush3.bf16.msra.mxu0 %v1380_v14  ;;  %v159_v45 = vsel %vm53_vm3, %v158_v41, 0.0  ;;  %v177_v47 = vpack.c.bf16 %v155_v42, %v161_v43  ;;  %v323_v49 = vpack.c.bf16 %v173_v44, %v170_v40  ;;  %v168_v50 = vsel %vm167_vm2, %v165_v32, %v166_v33 }
  0x62   :  { %v176_v51 = vpack.c.bf16 %v157_v37, %v159_v45  ;;  %1132 = vmatprep.subr.bf16.mxu0 %v1189_v36  ;;  %v171_v52 = vsel %vm167_vm2, %v166_v33, %v163_v24 }
  0x63   :  { %1134 = vmatprep.mubr.msk.bf16.mxu0 %vm59_vm0, %v323_v49  ;;  %v175_v53 = vsel %vm56_vm4, %v171_v52, 0.0 }
  0x64   :  { %1126 = vmatprep.mubr.msk.bf16.mxu1 %vm59_vm0, %v176_v51  ;;  %v324_v14 = vpack.c.bf16 %v175_v53, %v168_v50 }
  0x65   :  { %1127 = vmatmul.mubr.msk.bf16.vlgmr.msra.gmra.mxu1 %vm59_vm0, %v177_v47  ;;  %1133 = vmatpush3.bf16.msra.mxu0 %v1189_v36 }
  0x66   :  { %1139 = vmatpush3.bf16.msra.mxu1 %v1190_v54  ;;  %1146 = vmatprep.subr.bf16.mxu0 %v1192_v56 }
  0x67   :  { %1140 = vmatprep.subr.bf16.mxu1 %v1191_v55 }
  0x68   :  { %1135 = vmatmul.mubr.msk.bf16.vlgmr.msra.gmra.mxu0 %vm59_vm0, %v324_v14 }
  0x69   :  { %1147 = vmatpush3.bf16.msra.mxu0 %v1192_v56 }
  0x6a   :  { %1141 = vmatpush3.bf16.msra.mxu1 %v1191_v55  ;;  %1148 = vmatprep.subr.bf16.mxu0 %v1194_v58 }
  0x6b   :  { %1154 = vmatprep.subr.bf16.mxu1 %v1462_v57 }
  0x6d   :  { %1149 = vmatpush3.bf16.msra.mxu0 %v1194_v58 }
 0x120   :  { %v1120_v59 = vpop.f32.mrf.mxu0 }
 0x122   :  { %v241_v60 = vpop.f32.mrf.mxu0 }
 0x124   :  { %v1121_v61 = vpop.f32.mrf.mxu0 }
 0x125   :  { %v1128_v62 = vpop.f32.mrf.mxu1 }
 0x126   :  { %v244_v63 = vpop.f32.mrf.mxu0  ;;  %v317_v8 = vadd.f32 %v1128_v62, %v1120_v59 }
 0x127   :  { %v308_v0 = vpop.f32.mrf.mxu1 }
 0x128   :  { %v1136_v1 = vpop.f32.mrf.mxu0  ;;  %v309_v2 = vadd.f32 %v308_v0, %v241_v60  ;;  %v411_v0 = vld [vmem:[%s1569_s5] sm:$0x1] }
 0x129   :  { %v1129_v7 = vpop.f32.mrf.mxu1  ;;  %v399_v13 = vadd.f32 %v1136_v1, %v317_v8 }
 0x12a   :  { %v382_v9 = vpop.f32.mrf.mxu0  ;;  %v320_v12 = vadd.f32 %v1129_v7, %v1121_v61  ;;  %v412_v7 = vld [vmem:[%s1570_s6] sm:$0x1] }
 0x12b   :  { %v311_v10 = vpop.f32.mrf.mxu1  ;;  %v397_v11 = vadd.f32 %v382_v9, %v309_v2  ;;  %v409_v22 = vadd.f32 %v1051_v16, %v399_v13 }
 0x12c   :  { %v1137_v15 = vpop.f32.mrf.mxu0  ;;  %v312_v17 = vadd.f32 %v311_v10, %v244_v63 }
 0x12d   :  { %v407_v18 = vadd.f32 %v1051_v16, %v397_v11  ;;  %v400_v19 = vadd.f32 %v1137_v15, %v320_v12  ;;  %v429_v27 = vmul.f32 %v409_v22, %v409_v22  ;;  %v416_v32 = vsel %vm59_vm0, %v409_v22, 0.0 }
 0x12e   :  { %v385_v21 = vpop.f32.mrf.mxu0 }
 0x12f   :  { %v398_v23 = vadd.f32 %v385_v21, %v312_v17  ;;  %v427_v24 = vmul.f32 %v407_v18, %v407_v18  ;;  %v410_v25 = vadd.f32 %v1051_v16, %v400_v19  ;;  %v413_v28 = vsel %vm59_vm0, %v407_v18, 0.0 }
 0x130   :  { %v434_v38 = vsel %vm59_vm0, %v429_v27, 0.0 }
 0x131   :  { %v408_v26 = vadd.f32 %v1051_v16, %v398_v23  ;;  %v431_v33 = vsel %vm59_vm0, %v427_v24, 0.0  ;;  %v430_v34 = vmul.f32 %v410_v25, %v410_v25  ;;  %v418_v39 = vsel %vm59_vm0, %v410_v25, 0.0 }
 0x133   :  { %v414_v29 = vsel %vm59_vm0, %v408_v26, 0.0  ;;  %v428_v30 = vmul.f32 %v408_v26, %v408_v26  ;;  %v436_v42 = vsel %vm59_vm0, %v430_v34, 0.0 }
 0x134   :  { %v415_v31 = vadd.f32 %v414_v29, %v413_v28 }
 0x135   :  { %v432_v35 = vsel %vm59_vm0, %v428_v30, 0.0 }
 0x136   :  { %v417_v36 = vadd.f32 %v416_v32, %v415_v31  ;;  %v433_v37 = vadd.f32 %v432_v35, %v431_v33 }
 0x138   :  { %v419_v40 = vadd.f32 %v418_v39, %v417_v36  ;;  %v435_v41 = vadd.f32 %v434_v38, %v433_v37 }
 0x13a   :  { %v420_v43 = vrot.slane %v419_v40, 4  ;;  %v437_v44 = vadd.f32 %v436_v42, %v435_v41 }
 0x13c   :  { %v421_v45 = vadd.f32 %v420_v43, %v419_v40  ;;  %v438_v47 = vrot.slane %v437_v44, 4 }
 0x13e   :  { %v422_v49 = vrot.slane %v421_v45, 2  ;;  %v439_v50 = vadd.f32 %v438_v47, %v437_v44 }
 0x140   :  { %v423_v51 = vadd.f32 %v422_v49, %v421_v45  ;;  %v440_v52 = vrot.slane %v439_v50, 2 }
 0x142   :  { %v424_v53 = vrot.slane %v423_v51, 1  ;;  %v441_v14 = vadd.f32 %v440_v52, %v439_v50 }
 0x144   :  { %v425_v54 = vadd.f32 %v424_v53, %v423_v51  ;;  %v442_v55 = vrot.slane %v441_v14, 1  ;;  %v1195_v53 = vld [vmem:[%s1571_s7 + $0x20] sm:$0xff]  }
 0x146   :  { %v426_v56 = vmul.f32 0.03125, %v425_v54  ;;  %v443_v58 = vadd.f32 %v442_v55, %v441_v14 }
 0x148   :  { %v444_v59 = vmul.f32 0.03125, %v443_v58  ;;  %v445_v60 = vmul.f32 %v426_v56, %v426_v56 }
 0x14a   :  { %v446_v61 = vsub.f32 %v444_v59, %v445_v60 }
 0x14c   :  { %v447_v62 = vmax.f32 %v446_v61, 0.0 }
 0x14e   :  { %v448_v63 = vadd.f32 1e-05, %v447_v62 }
 0x150   :  { %1214 = vrsqrt.f32 %v448_v63 }
 0x15d   :  { %v1215_v1 = vpop.eup %1214 }
 0x15e   :  { %v450_v2 = vmul.f32 %v1215_v1, %v411_v0 }
 0x160   :  { %v451_v8 = vmul.f32 %v450_v2, %v426_v56  ;;  %v457_v9 = vrot.slane %v450_v2, %v1398_v48 }
 0x162   :  { %v452_v10 = vsub.f32 %v412_v7, %v451_v8  ;;  %v460_v11 = vmul.f32 %v457_v9, %v408_v26  ;;  %v459_v13 = vmul.f32 %v457_v9, %v407_v18  ;;  %v461_v15 = vmul.f32 %v457_v9, %v409_v22 }
 0x163   :  { %v462_v16 = vmul.f32 %v457_v9, %v410_v25 }
 0x164   :  { %v467_v12 = vrot.slane %v452_v10, %v1398_v48  ;;  %v785_v10 = vld [vmem:[%s1573_s9 + $0x18] sm:$0xff] }
 0x166   :  { %v470_v17 = vadd.f32 %v467_v12, %v460_v11  ;;  %v469_v19 = vadd.f32 %v467_v12, %v459_v13  ;;  %v471_v21 = vadd.f32 %v467_v12, %v461_v15  ;;  %v472_v23 = vadd.f32 %v467_v12, %v462_v16  ;;  %v784_v12 = vld [vmem:[%s1573_s9 + $0x10] sm:$0xff]  ;;  %v782_v13 = vld [vmem:[%s1573_s9] sm:$0xff] }
 0x167   :  { %v1258_v11 = vmov 0.0   ;;  %v870_v15 = vld [vmem:[%s1575_s11] sm:$0xf] }
 0x168   :  { %v1053_v24 = vmul.f32 -1.442695, %v470_v17  ;;  %v1052_v27 = vmul.f32 -1.442695, %v469_v19  ;;  %v1054_v28 = vmul.f32 -1.442695, %v471_v21  ;;  %1162 = vmatprep.subr.mxu0 %v1258_v11 }
 0x169   :  { %v1055_v29 = vmul.f32 -1.442695, %v472_v23 }
 0x16a   :  { %1216 = vpow2.f32 %v1053_v24 }
 0x16b   :  { %1218 = vpow2.f32 %v1052_v27 }
 0x16c   :  { %1220 = vpow2.f32 %v1054_v28 }
 0x16d   :  { %1222 = vpow2.f32 %v1055_v29 }
 0x177   :  { %v1217_v30 = vpop.eup %1216 }
 0x178   :  { %v1219_v31 = vpop.eup %1218  ;;  %v486_v26 = vadd.f32 1.0, %v1217_v30 }
 0x179   :  { %v1221_v32 = vpop.eup %1220  ;;  %v485_v33 = vadd.f32 1.0, %v1219_v31 }
 0x17a   :  { %v1223_v18 = vpop.eup %1222  ;;  %1224 = vrcp.f32 %v486_v26  ;;  %v487_v22 = vadd.f32 1.0, %v1221_v32  ;;  %v1076_v26 = vld [vmem:[%s1572_s8] ss:$0 sm:$0xff] }
 0x17b   :  { %1226 = vrcp.f32 %v485_v33  ;;  %v488_v25 = vadd.f32 1.0, %v1223_v18 }
 0x17c   :  { %1228 = vrcp.f32 %v487_v22 }
 0x17d   :  { %1230 = vrcp.f32 %v488_v25 }
 0x187   :  { %v1225_v34 = vpop.eup %1224 }
 0x188   :  { %v1227_v35 = vpop.eup %1226  ;;  %v498_v36 = vmul.f32 %v1225_v34, %v470_v17 }
 0x189   :  { %v1229_v37 = vpop.eup %1228  ;;  %v497_v38 = vmul.f32 %v1227_v35, %v469_v19 }
 0x18a   :  { %v1231_v39 = vpop.eup %1230  ;;  %v499_v40 = vmul.f32 %v1229_v37, %v471_v21  ;;  %v503_v41 = vrot.slane %v498_v36, 7  ;;  %v515_v42 = vrot.slane %v498_v36, 1 }
 0x18b   :  { %v532_v43 = vpack.c.bf16 %v498_v36, %v497_v38  ;;  %v500_v44 = vmul.f32 %v1231_v39, %v472_v23  ;;  %v502_v45 = vrot.slane %v497_v38, 7  ;;  %v514_v47 = vrot.slane %v497_v38, 1 }
 0x18c   :  { %v516_v49 = vrot.slane %v499_v40, 1  ;;  %v504_v50 = vrot.slane %v499_v40, 7 }
 0x18d   :  { %1142 = vmatprep.mubr.msk.bf16.mxu1 %vm59_vm0, %v532_v43  ;;  %v533_v51 = vpack.c.bf16 %v500_v44, %v499_v40  ;;  %v505_v52 = vrot.slane %v500_v44, 7  ;;  %v520_v14 = vsel %vm167_vm2, %v514_v47, %v515_v42  ;;  %v508_v54 = vsel %vm154_vm1, %v502_v45, %v503_v41 }
 0x18e   :  { %v519_v55 = vsel %vm167_vm2, %v515_v42, %v516_v49  ;;  %v507_v56 = vsel %vm154_vm1, %v503_v41, %v504_v50  ;;  %v517_v58 = vrot.slane %v500_v44, 1 }
 0x18f   :  { %1143 = vmatmul.mubr.msk.bf16.vlgmr.msra.gmra.mxu1 %vm59_vm0, %v533_v51  ;;  %v509_v59 = vsel %vm154_vm1, %v505_v52, %v502_v45  ;;  %v523_v60 = vsel %vm56_vm4, %v519_v55, 0.0  ;;  %v506_v61 = vsel %vm154_vm1, %v504_v50, %v505_v52  ;;  %v512_v62 = vsel %vm53_vm3, %v507_v56, 0.0 }
 0x190   :  { %1155 = vmatpush3.bf16.msra.mxu1 %v1462_v57  ;;  %v510_v63 = vsel %vm53_vm3, %v509_v59, 0.0  ;;  %v673_v0 = vpack.c.bf16 %v523_v60, %v520_v14  ;;  %v527_v1 = vpack.c.bf16 %v506_v61, %v512_v62  ;;  %v521_v7 = vsel %vm167_vm2, %v517_v58, %v514_v47 }
 0x191   :  { %v526_v2 = vpack.c.bf16 %v508_v54, %v510_v63  ;;  %1156 = vmatprep.subr.bf16.mxu1 %v1195_v53  ;;  %v518_v8 = vsel %vm167_vm2, %v516_v49, %v517_v58  ;;  %v525_v9 = vsel %vm56_vm4, %v521_v7, 0.0 }
 0x192   :  { %1158 = vmatprep.mubr.msk.bf16.mxu1 %vm59_vm0, %v673_v0  ;;  %v674_v57 = vpack.c.bf16 %v525_v9, %v518_v8 }
 0x193   :  { %1150 = vmatprep.mubr.msk.bf16.mxu0 %vm59_vm0, %v526_v2 }
 0x194   :  { %1151 = vmatmul.mubr.msk.bf16.vlgmr.msra.gmra.mxu0 %vm59_vm0, %v527_v1  ;;  %1157 = vmatpush3.bf16.msra.mxu1 %v1195_v53  ;;  %v1077_v1 = vld [vmem:[%s1574_s10] ss:$0 sm:$0xff]  ;;  %s1261_s10 = smov [#allocation2]  }
 0x195   :  { %1170 = vmatprep.mubr.msk.f32.mxu0 %vm1259_vm5, %v1258_v11  ;;  %1163 = vmatpush3.msra.mxu0 %v785_v10 }
 0x196   :  { %1173 = vmatprep.subr.mxu1 %v1258_v11  ;;  %1164 = vmatprep.subr.mxu0 %v1258_v11 }
 0x197   :  { %1159 = vmatmul.mubr.msk.bf16.vlgmr.msra.gmra.mxu1 %vm59_vm0, %v674_v57  ;;  %1165 = vmatpush3.msra.mxu0 %v784_v12  ;;  %v1079_v57 = vld [vmem:[%s1576_s12] ss:$0 sm:$0xff]  ;;  %s1016_s12 = sshll.u32 %s1261_s10, 4  ;;  %s1017_s12 = int_to_ptr.vmem [resolvable:$true] %s1016_s12 }
 0x198   :  { %1175 = vmatprep.mubr.msk.f32.mxu1 %vm1259_vm5, %v1258_v11  ;;  %1166 = vmatprep.subr.mxu0 %v1258_v11  ;;  %s1236_s17 = scalar_lea.vmem %s1017_s12, 512  ;;  %p1241_p1 = scmp.lt.s32.totalorder %s1017_s12, %s1017_s12 }
 0x199   :  { %1167 = vmatpush3.msra.mxu0 %v783_v20  ;;  %1174 = vmatpush3.msk.msra.mxu1 %vm882_vm6, %v870_v15  ;;  %p1237_p0 = scmp.ne.s32.totalorder %s1017_s12, %s1236_s17  ;;  %p1242_p2 = scmp.lt.s32.totalorder %s1236_s17, %s1236_s17 }
 0x19a   :  { %1168 = vmatprep.subr.mxu0 %v1258_v11 }
 0x19b   :  { %1169 = vmatpush3.msra.mxu0 %v782_v13  ;;  %p1243_p3 = por %p1242_p2, %p1241_p1 }
 0x19d   :  { %p1244_p4 = pnand %p1243_p3, %p1237_p0 }
 0x24f   :  { %v1144_v16 = vpop.f32.mrf.mxu1 }
 0x251   :  { %v591_v17 = vpop.f32.mrf.mxu1 }
 0x253   :  { %v1145_v19 = vpop.f32.mrf.mxu1 }
 0x254   :  { %v1152_v21 = vpop.f32.mrf.mxu0 }
 0x255   :  { %v594_v23 = vpop.f32.mrf.mxu1  ;;  %v667_v24 = vadd.f32 %v1152_v21, %v1144_v16  ;;  %v1260_v16 = vmov 1966171168  }
 0x256   :  { %v658_v27 = vpop.f32.mrf.mxu0 }
 0x257   :  { %v1160_v28 = vpop.f32.mrf.mxu1  ;;  %v659_v29 = vadd.f32 %v658_v27, %v591_v17  ;;  %v964_v17 = vunpack.c.l.s4 %v1260_v16 }
 0x258   :  { %v1153_v30 = vpop.f32.mrf.mxu0  ;;  %v749_v31 = vadd.f32 %v1160_v28, %v667_v24 }
 0x259   :  { %v732_v32 = vpop.f32.mrf.mxu1  ;;  %v670_v33 = vadd.f32 %v1153_v30, %v1145_v19  ;;  %v965_v19 = vunpack.c.0.s8 %v964_v17 }
 0x25a   :  { %v661_v18 = vpop.f32.mrf.mxu0  ;;  %v747_v22 = vadd.f32 %v732_v32, %v659_v29  ;;  %v759_v34 = vadd.f32 %v1076_v26, %v749_v31 }
 0x25b   :  { %v1161_v25 = vpop.f32.mrf.mxu1  ;;  %v662_v35 = vadd.f32 %v661_v18, %v594_v23  ;;  %v968_v21 = vsub.s32 %v965_v19, %v1392_v46 }
 0x25c   :  { %v750_v36 = vadd.f32 %v1161_v25, %v670_v33  ;;  %v757_v38 = vadd.f32 %v1076_v26, %v747_v22  ;;  %v770_v41 = vsel %vm59_vm0, %v759_v34, 0.0 }
 0x25d   :  { %v735_v37 = vpop.f32.mrf.mxu1 }
 0x25e   :  { %v760_v39 = vadd.f32 %v1076_v26, %v750_v36  ;;  %v748_v40 = vadd.f32 %v735_v37, %v662_v35  ;;  %v761_v45 = vsel %vm59_vm0, %v757_v38, 0.0 }
 0x260   :  { %v771_v42 = vsel %vm59_vm0, %v760_v39, 0.0  ;;  %v758_v43 = vadd.f32 %v1076_v26, %v748_v40 }
 0x261   :  { %v772_v44 = vadd.f32 %v771_v42, %v770_v41 }
 0x262   :  { %v762_v47 = vsel %vm59_vm0, %v758_v43, 0.0 }
 0x263   :  { %v773_v49 = vrot.slane %v772_v44, 4  ;;  %v763_v50 = vadd.f32 %v762_v47, %v761_v45 }
 0x265   :  { %v774_v51 = vadd.f32 %v773_v49, %v772_v44  ;;  %v764_v52 = vrot.slane %v763_v50, 4 }
 0x267   :  { %v775_v53 = vrot.slane %v774_v51, 2  ;;  %v765_v14 = vadd.f32 %v764_v52, %v763_v50 }
 0x269   :  { %v776_v54 = vadd.f32 %v775_v53, %v774_v51  ;;  %v766_v55 = vrot.slane %v765_v14, 2 }
 0x26b   :  { %v777_v56 = vrot.slane %v776_v54, 1  ;;  %v767_v58 = vadd.f32 %v766_v55, %v765_v14 }
 0x26d   :  { %v768_v59 = vrot.slane %v767_v58, 1  ;;  %v778_v60 = vadd.f32 %v777_v56, %v776_v54 }
 0x26f   :  { %v769_v61 = vadd.f32 %v768_v59, %v767_v58  ;;  %v781_v63 = vmul.f32 0.0625, %v778_v60 }
 0x271   :  { %v780_v62 = vmul.f32 0.0625, %v769_v61 }
 0x273   :  { %v796_v0 = vsel %vm795_vm7, %v781_v63, %v780_v62 }
 0x274   :  { %1171 = vmatmul.mubr.msk.f32.vlgmr.msra.gmra.mxu0 %vm59_vm0, %v796_v0 }
 0x334   :  { %v865_v2 = vpop.f32.mrf.mxu0 }
 0x335   :  { %v866_v7 = vadd.f32 %v1077_v1, %v865_v2 }
 0x336   :  { %v1172_v8 = vpop.f32.mrf.mxu0 }
 0x337   :  { %v869_v9 = vmax.f32 %v866_v7, 0.0 }
 0x339   :  { %1176 = vmatmul.mubr.msk.f32.vlgmr.msra.gmra.mxu1 %vm878_vm8, %v869_v9 }
 0x3f9   :  { %v952_v10 = vpop.f32.mrf.mxu1 }
 0x3fa   :  { %v953_v11 = vadd.f32 %v1079_v57, %v952_v10 }
 0x3fb   :  { %v1177_v12 = vpop.f32.mrf.mxu1 }
 0x3fc   :  { %v1082_v20 = vmul.f32 -1.442695, %v953_v11 }
 0x3fe   :  { %1232 = vpow2.f32 %v1082_v20 }
 0x40b   :  { %v1233_v13 = vpop.eup %1232 }
 0x40c   :  { %v959_v15 = vadd.f32 1.0, %v1233_v13 }
 0x40e   :  { %1234 = vrcp.f32 %v959_v15 }
 0x41b   :  { %v1235_v23 = vpop.eup %1234 }
 0x41c   :  { %v969_v24 = vrot.slane %v1235_v23, %v968_v21 }
 0x41e   :  { %v970_v27 = vcombine.high %v969_v24, %v969_v24  ;;  %v977_v28 = vrot.slane %v969_v24, %v968_v21 }
 0x420   :  { %v984_v29 = vrot.slane %v970_v27, %v968_v21  ;;  %v988_v30 = vrot.slane %v977_v28, %v1398_v48 }
 0x422   :  { %v992_v31 = vrot.slane %v984_v29, %v1398_v48  ;;  %v995_v26 = vmul.f32 %v988_v30, %v757_v38  ;;  %v996_v32 = vmul.f32 %v988_v30, %v758_v43 }
 0x424   :  { %v997_v33 = vmul.f32 %v992_v31, %v759_v34  ;;  %v998_v18 = vmul.f32 %v992_v31, %v760_v39  ;;  %v999_v22 = vmul.f32 0.1, %v995_v26  ;;  %v1000_v25 = vmul.f32 0.1, %v996_v32 }
 0x426   :  { %v1001_v35 = vmul.f32 0.1, %v997_v33  ;;  %v1002_v36 = vmul.f32 0.1, %v998_v18  ;;  %v1003_v46 = vadd.f32 %v999_v22, %v1346_v3  ;;  %v1004_v37 = vadd.f32 %v1000_v25, %v1351_v4 }
 0x428   :  { %v1005_v40 = vadd.f32 %v1001_v35, %v1356_v5  ;;  %v1006_v41 = vadd.f32 %v1002_v36, %v1361_v6  ;;  %1007 = vst.msk [vmem:[#allocation2] sm:$0xff] %vm59_vm0, %v1003_v46  ;;  %1008 = vst.msk [vmem:[#allocation2 + $0x8] sm:$0xff] %vm59_vm0, %v1004_v37 }
 0x42a   :  { %1009 = vst.msk [vmem:[#allocation2 + $0x10] sm:$0xff] %vm59_vm0, %v1005_v40  ;;  %1010 = vst.msk [vmem:[#allocation2 + $0x18] sm:$0xff] %vm59_vm0, %v1006_v41 }
 0x42b   :  { %1247 = shalt.err (!%p1244_p4)
}
 0x42c   :  { %s1262_s18 = smov 128   ;;  %s1263_s19 = smov 8  }
 0x42d   :  { %1022 = dma.vmem_to_hbm [thread:$0]  %s1017_s12, 512, %s1577_s13, [#allocation3], %s1262_s18, %s1262_s18, %s1263_s19  }
 0x42e   :  { %1256 = dma.done.wait [#allocation3], 512  }
 0x42f   :  { %1257 = vsyncadd [#allocation3], 4294966784 }
 0x430   :  { %1026 = vsyncpa [#allocation3], 1 }

</bundles_post_ra>
